<compile_context>
chip_gen: v7x
topology: tpu7x:2x2x1
jax: 0.10.0
libtpu: 0.0.40
codegen_flags: <defaults>
</compile_context>

<pallas_src>
import functools

import jax
import jax.numpy as jnp
from jax.experimental import pallas as pl
from jax.experimental.pallas import tpu as pltpu


def _moving_avg_kernel(x_ref, o_ref, xp_ref, *, kernel_size, stride, pad, l_out):
    # x_ref : (bB, L,        bC) VMEM input block
    # o_ref : (bB, l_out,    bC) VMEM output block
    # xp_ref: (bB, L + 2*pad, bC) VMEM scratch holding the edge-replicated sequence
    bB, L, bC = x_ref.shape

    # Stage the edge-replicated sequence once into VMEM scratch (one copy instead
    # of K misaligned value-level slices of an in-register concatenate).
    xp_ref[:, pad:pad + L, :] = x_ref[...]
    if pad > 0:
        front = jnp.broadcast_to(x_ref[:, 0:1, :], (bB, pad, bC))
        end = jnp.broadcast_to(x_ref[:, L - 1:L, :], (bB, pad, bC))
        xp_ref[:, 0:pad, :] = front
        xp_ref[:, pad + L:pad + L + pad, :] = end

    def window(j):
        # Read the j-th shifted pooling window straight from the scratch ref
        # (vector-load path; static start, static size).
        if stride == 1:
            return xp_ref[:, pl.ds(j, l_out), :]
        return xp_ref[:, pl.ds(j, l_out, stride=stride), :]

    # AvgPool1d over the sequence axis: K shifted ref reads + VPU adds in f32.
    acc = window(0).astype(jnp.float32)
    for j in range(1, kernel_size):               # static unroll, K is tiny
        acc = acc + window(j).astype(jnp.float32)

    o_ref[...] = (acc * (1.0 / kernel_size)).astype(o_ref.dtype)


def moving_avg(x, kernel_size, stride, *, block_b=None, block_c=None):
    """x: (B, L, C) float array -> (B, L_out, C), matching the PyTorch module."""
    B, L, C = x.shape
    pad = (kernel_size - 1) // 2
    l_out = (L + 2 * pad - kernel_size) // stride + 1
    assert l_out >= 1

    itemsize = jnp.dtype(x.dtype).itemsize

    # Lane (C) tiling: multiples of 128 keep output stores unmasked full-lane vst.
    # If C is not a multiple of 128, keep the whole C axis in one block.
    if block_c is None:
        block_c = min(C, 512) if C % 128 == 0 else C
    # Batch tiling: the full L axis lives inside every block (no halo). Pick
    # block_b so one input block stays around ~2 MiB -- safe with double-buffered
    # in/out blocks + the xp scratch + f32 accumulator on v5e/v6e/v7x VMEM.
    if block_b is None:
        target_bytes = 2 * 1024 * 1024
        row_bytes = (L + 2 * pad) * block_c * itemsize
        block_b = max(1, min(B, target_bytes // max(1, row_bytes)))

    grid = (pl.cdiv(B, block_b), pl.cdiv(C, block_c))

    # Explicit VMEM budget: double-buffered input/output blocks + scratch + f32 acc.
    bytes_in = block_b * L * block_c * itemsize
    bytes_out = block_b * l_out * block_c * itemsize
    bytes_xp = block_b * (L + 2 * pad) * block_c * itemsize
    bytes_acc = block_b * l_out * block_c * 4
    vmem_bytes = 2 * (bytes_in + bytes_out) + bytes_xp + bytes_acc
    vmem_limit = int(min(64 << 20, max(8 << 20, 3 * vmem_bytes)))

    cost = pl.CostEstimate(
        flops=B * l_out * C * kernel_size,       # (K-1) adds + 1 mul per output elem
        transcendentals=0,
        bytes_accessed=(B * L * C + B * l_out * C) * itemsize)

    kernel = functools.partial(
        _moving_avg_kernel,
        kernel_size=kernel_size, stride=stride, pad=pad, l_out=l_out)

    return pl.pallas_call(
        kernel,
        out_shape=jax.ShapeDtypeStruct((B, l_out, C), x.dtype),
        grid_spec=pltpu.PrefetchScalarGridSpec(
            num_scalar_prefetch=0,
            grid=grid,
            in_specs=[pl.BlockSpec((block_b, L, block_c), lambda b, c: (b, 0, c))],
            out_specs=pl.BlockSpec((block_b, l_out, block_c), lambda b, c: (b, 0, c)),
            scratch_shapes=[pltpu.VMEM((block_b, L + 2 * pad, block_c), x.dtype)],
        ),
        compiler_params=pltpu.CompilerParams(
            dimension_semantics=("parallel", "parallel"),
            vmem_limit_bytes=vmem_limit),
        cost_estimate=cost,
    )(x)


if __name__ == "__main__":
    # Small shapes consistent with the module: (batch, seq_len, channels).
    # Channels = 128 keeps the output lane-dense (full-lane stores).
    B, L, C = 2, 16, 128
    kernel_size, stride = 5, 1

    x = jax.random.normal(jax.random.PRNGKey(0), (B, L, C), dtype=jnp.float32)

    out = moving_avg(x, kernel_size, stride)
    out = jax.block_until_ready(out)

    # Also run with forced tiling (grid over B) to exercise the pipelined path /
    # index maps on these tiny shapes.
    out_tiled = jax.block_until_ready(
        moving_avg(x, kernel_size, stride, block_b=1, block_c=128))

    # Pure-JAX reference mirroring the PyTorch module exactly.
    pad = (kernel_size - 1) // 2
    front = jnp.repeat(x[:, 0:1, :], pad, axis=1)
    end = jnp.repeat(x[:, -1:, :], pad, axis=1)
    xp = jnp.concatenate([front, x, end], axis=1)
    l_out = (L + 2 * pad - kernel_size) // stride + 1
    ref = jnp.stack(
        [xp[:, t * stride:t * stride + kernel_size, :].mean(axis=1)
         for t in range(l_out)], axis=1)

    assert out.shape == ref.shape == (B, l_out, C), (out.shape, ref.shape)
    assert jnp.allclose(out, ref, atol=1e-5, rtol=1e-5), "mismatch vs reference"
    assert jnp.allclose(out_tiled, ref, atol=1e-5, rtol=1e-5), "tiled mismatch"

    print("KERNEL_OK")
</pallas_src>

<mosaic_0001>
module attributes {stable_mosaic.version = 11 : i64} {
  func.func @_moving_avg_kernel(%arg0: i32, %arg1: i32, %arg2: memref<2x16x128xf32, #tpu.memory_space<vmem>>, %arg3: memref<2x16x128xf32, #tpu.memory_space<vmem>>, %arg4: memref<2x20x128xf32, #tpu.memory_space<vmem>>) attributes {dimension_semantics = [#tpu.dimension_semantics<parallel>, #tpu.dimension_semantics<parallel>], iteration_bounds = array<i64: 1, 1>, scalar_prefetch = 0 : i64, scratch_operands = 1 : i64, tpu.core_type = #tpu.core_type<tc>, window_params = [{transform_indices = @transform_0, window_bounds = array<i64: 2, 16, 128>}, {transform_indices = @transform_1, window_bounds = array<i64: 2, 16, 128>}]} {
    %c0 = arith.constant 0 : index
    %c0_0 = arith.constant 0 : index
    %c0_1 = arith.constant 0 : index
    %0 = vector.load %arg2[%c0, %c0_0, %c0_1] : memref<2x16x128xf32, #tpu.memory_space<vmem>>, vector<2x16x128xf32>
    %c0_2 = arith.constant 0 : index
    %c2 = arith.constant 2 : index
    %c0_3 = arith.constant 0 : index
    %1 = vector.load %arg4[%c0_2, %c2, %c0_3] : memref<2x20x128xf32, #tpu.memory_space<vmem>>, vector<2x16x128xf32>
    tpu.vector_store %arg4[%c0_2, %c2, %c0_3], %0 {strides = array<i32>} : memref<2x20x128xf32, #tpu.memory_space<vmem>>, vector<2x16x128xf32>,
    %c0_4 = arith.constant 0 : index
    %c0_5 = arith.constant 0 : index
    %c0_6 = arith.constant 0 : index
    %2 = vector.load %arg2[%c0_4, %c0_5, %c0_6] : memref<2x16x128xf32, #tpu.memory_space<vmem>>, vector<2x1x128xf32>
    %3 = vector.shape_cast %2 : vector<2x1x128xf32> to vector<2x1x128xf32>
    %4 = vector.broadcast %3 : vector<2x1x128xf32> to vector<2x2x128xf32>
    %c0_7 = arith.constant 0 : index
    %c15 = arith.constant 15 : index
    %c0_8 = arith.constant 0 : index
    %5 = vector.load %arg2[%c0_7, %c15, %c0_8] : memref<2x16x128xf32, #tpu.memory_space<vmem>>, vector<2x1x128xf32>
    %6 = vector.shape_cast %5 : vector<2x1x128xf32> to vector<2x1x128xf32>
    %7 = vector.broadcast %6 : vector<2x1x128xf32> to vector<2x2x128xf32>
    %c0_9 = arith.constant 0 : index
    %c0_10 = arith.constant 0 : index
    %c0_11 = arith.constant 0 : index
    %8 = vector.load %arg4[%c0_9, %c0_10, %c0_11] : memref<2x20x128xf32, #tpu.memory_space<vmem>>, vector<2x2x128xf32>
    tpu.vector_store %arg4[%c0_9, %c0_10, %c0_11], %4 {strides = array<i32>} : memref<2x20x128xf32, #tpu.memory_space<vmem>>, vector<2x2x128xf32>,
    %c0_12 = arith.constant 0 : index
    %c18 = arith.constant 18 : index
    %c0_13 = arith.constant 0 : index
    %9 = vector.load %arg4[%c0_12, %c18, %c0_13] : memref<2x20x128xf32, #tpu.memory_space<vmem>>, vector<2x2x128xf32>
    tpu.vector_store %arg4[%c0_12, %c18, %c0_13], %7 {strides = array<i32>} : memref<2x20x128xf32, #tpu.memory_space<vmem>>, vector<2x2x128xf32>,
    %c0_14 = arith.constant 0 : index
    %c0_15 = arith.constant 0 : index
    %c0_16 = arith.constant 0 : index
    %10 = vector.load %arg4[%c0_14, %c0_15, %c0_16] : memref<2x20x128xf32, #tpu.memory_space<vmem>>, vector<2x16x128xf32>
    %c0_17 = arith.constant 0 : index
    %c1 = arith.constant 1 : index
    %c0_18 = arith.constant 0 : index
    %11 = vector.load %arg4[%c0_17, %c1, %c0_18] : memref<2x20x128xf32, #tpu.memory_space<vmem>>, vector<2x16x128xf32>
    %12 = arith.addf %10, %11 : vector<2x16x128xf32>
    %c0_19 = arith.constant 0 : index
    %c2_20 = arith.constant 2 : index
    %c0_21 = arith.constant 0 : index
    %13 = vector.load %arg4[%c0_19, %c2_20, %c0_21] : memref<2x20x128xf32, #tpu.memory_space<vmem>>, vector<2x16x128xf32>
    %14 = arith.addf %12, %13 : vector<2x16x128xf32>
    %c0_22 = arith.constant 0 : index
    %c3 = arith.constant 3 : index
    %c0_23 = arith.constant 0 : index
    %15 = vector.load %arg4[%c0_22, %c3, %c0_23] : memref<2x20x128xf32, #tpu.memory_space<vmem>>, vector<2x16x128xf32>
    %16 = arith.addf %14, %15 : vector<2x16x128xf32>
    %c0_24 = arith.constant 0 : index
    %c4 = arith.constant 4 : index
    %c0_25 = arith.constant 0 : index
    %17 = vector.load %arg4[%c0_24, %c4, %c0_25] : memref<2x20x128xf32, #tpu.memory_space<vmem>>, vector<2x16x128xf32>
    %18 = arith.addf %16, %17 : vector<2x16x128xf32>
    %cst = arith.constant 2.000000e-01 : f32
    %19 = vector.broadcast %cst : f32 to vector<2x16x128xf32>
    %20 = arith.mulf %18, %19 : vector<2x16x128xf32>
    %c0_26 = arith.constant 0 : index
    %c0_27 = arith.constant 0 : index
    %c0_28 = arith.constant 0 : index
    %21 = vector.load %arg3[%c0_26, %c0_27, %c0_28] : memref<2x16x128xf32, #tpu.memory_space<vmem>>, vector<2x16x128xf32>
    tpu.vector_store %arg3[%c0_26, %c0_27, %c0_28], %20 {strides = array<i32>} : memref<2x16x128xf32, #tpu.memory_space<vmem>>, vector<2x16x128xf32>,
    return
  }
  func.func @transform_0(%arg0: i32, %arg1: i32) -> (i32, i32, i32) {
    %c0_i32 = arith.constant 0 : i32
    %c0_i32_0 = arith.constant 0 : i32
    return %arg0, %c0_i32, %arg1 : i32, i32, i32
  }
  func.func @transform_1(%arg0: i32, %arg1: i32) -> (i32, i32, i32) {
    %c0_i32 = arith.constant 0 : i32
    %c0_i32_0 = arith.constant 0 : i32
    return %arg0, %c0_i32, %arg1 : i32, i32, i32
  }
}

</mosaic_0001>

<bundles_post_ra>
// kernel: tpu_custom_call.1
= control target key start
LH: loop header
LB: loop body
LE: loop exit
PB: predicated region body
PF: predicated region fallthrough
CT: control target
= control target key end

     0   :  { %6 = vsyncpa [#allocation4], 0  ;;  %s216_s0 = inlined_call_operand.hbm [shape: f32[2,16,128], index: 0, kind: input, shape index: {}]   ;;  %s217_s1 = inlined_call_operand.hbm [shape: f32[2,16,128], index: 1, kind: output, shape index: {}]  }
   0x1   :  { %7 = vsyncpa [#allocation5], 0  ;;  %s172_s6 = smov [#allocation3]   ;;  %s124_s10 = scalar_lea.hbm %s216_s0, 512 }
   0x2   :  { %s13_s7 = sshll.u32 %s172_s6, 4  ;;  %p125_p0 = scmp.ne.s32.totalorder %s216_s0, %s124_s10  ;;  %s14_s7 = int_to_ptr.vmem [resolvable:$true] %s13_s7 }
   0x3   :  { %p128_p1 = scmp.lt.u32.totalorder %s124_s10, %s216_s0 }
   0x5   :  { %p130_p2 = pnand %p128_p1, %p125_p0 }
   0x7   :  { %133 = shalt.err (!%p130_p2)
}
   0x8   :  { %s134_s15 = scalar_lea.vmem %s14_s7, 512  ;;  %p139_p4 = scmp.lt.s32.totalorder %s14_s7, %s14_s7 }
   0x9   :  { %p135_p3 = scmp.ne.s32.totalorder %s14_s7, %s134_s15  ;;  %p140_p5 = scmp.lt.s32.totalorder %s134_s15, %s134_s15 }
   0xb   :  { %p141_p6 = por %p140_p5, %p139_p4 }
   0xd   :  { %p142_p7 = pnand %p141_p6, %p135_p3 }
   0xf   :  { %145 = shalt.err (!%p142_p7)
}
  0x10   :  { %s173_s16 = smov 128   ;;  %s174_s17 = smov 8  }
  0x11   :  { %19 = dma.hbm_to_vmem [thread:$0]  %s216_s0, 512, %s14_s7, [#allocation4], %s173_s16, %s173_s16, %s174_s17  }
  0x12   :  { %168 = dma.done.wait [#allocation4], 512  }
  0x13   :  { %169 = vsyncadd [#allocation4], 4294966784  ;;  %v23_v0 = vld [vmem:[#allocation3] sm:$0xff]  ;;  %v24_v1 = vld [vmem:[#allocation3 + $0x8] sm:$0xff]  ;;  %s175_s0 = smov [#allocation6]  }
  0x14   :  { %v25_v2 = vld [vmem:[#allocation3 + $0x10] sm:$0xff]  ;;  %27 = vst [vmem:[#allocation2 + $0x2] sm:$0xff] %v23_v0  ;;  %28 = vst [vmem:[#allocation2 + $0xa] sm:$0xff] %v24_v1  ;;  %v26_v3 = vld [vmem:[#allocation3 + $0x18] sm:$0xff]  ;;  %s104_s20 = sshll.u32 %s175_s0, 4  ;;  %s105_s20 = int_to_ptr.vmem [resolvable:$true] %s104_s20 }
  0x15   :  { %29 = vst [vmem:[#allocation2 + $0x1a] sm:$0xff] %v25_v2  ;;  %v116_v4 = vld [vmem:[#allocation3] ss:$0 sm:$0xff]  ;;  %v117_v5 = vld [vmem:[#allocation3 + $0x10] ss:$0 sm:$0xff]  ;;  %30 = vst [vmem:[#allocation2 + $0x22] sm:$0xff] %v26_v3  ;;  %p151_p9 = scmp.lt.s32.totalorder %s105_s20, %s105_s20 }
  0x16   :  { %51 = vst [vmem:[#allocation2] sm:$0x3] %v116_v4  ;;  %52 = vst [vmem:[#allocation2 + $0x18] sm:$0x3] %v117_v5  ;;  %v118_v6 = vld [vmem:[#allocation3 + $0xf] ss:$0 sm:$0xff] }
  0x17   :  { %v119_v7 = vld [vmem:[#allocation3 + $0x1f] ss:$0 sm:$0xff]  ;;  %53 = vst [vmem:[#allocation2 + $0x12] sm:$0x3] %v118_v6  ;;  %s146_s21 = scalar_lea.vmem %s105_s20, 512 }
  0x18   :  { %54 = vst [vmem:[#allocation2 + $0x2a] sm:$0x3] %v119_v7  ;;  %p147_p8 = scmp.ne.s32.totalorder %s105_s20, %s146_s21  ;;  %p152_p10 = scmp.lt.s32.totalorder %s146_s21, %s146_s21 }
  0x1a   :  { %p153_p11 = por %p152_p10, %p151_p9 }
  0x1b   :  { %v56_v8 = vld [vmem:[#allocation2 + $0x8] sm:$0xff] }
  0x1c   :  { %v60_v11 = vld [vmem:[#allocation2 + $0x9] sm:$0xff]  ;;  %v58_v19 = vld [vmem:[#allocation2 + $0x20] sm:$0xff]  ;;  %p154_p12 = pnand %p153_p11, %p147_p8 }
  0x1d   :  { %v55_v9 = vld [vmem:[#allocation2] sm:$0xff]  ;;  %v64_v13 = vadd.f32 %v60_v11, %v56_v8  ;;  %v57_v14 = vld [vmem:[#allocation2 + $0x18] sm:$0xff] }
  0x1e   :  { %v59_v10 = vld [vmem:[#allocation2 + $0x1] sm:$0xff]  ;;  %v61_v15 = vld [vmem:[#allocation2 + $0x19] sm:$0xff]  ;;  %v76_v22 = vld [vmem:[#allocation2 + $0xb] sm:$0xff] }
  0x1f   :  { %v63_v12 = vadd.f32 %v59_v10, %v55_v9  ;;  %v72_v17 = vadd.f32 %v64_v13, %v24_v1  ;;  %v65_v18 = vadd.f32 %v61_v15, %v57_v14  ;;  %v62_v20 = vld [vmem:[#allocation2 + $0x21] sm:$0xff]  ;;  %v84_v28 = vld [vmem:[#allocation2 + $0xc] sm:$0xff] }
  0x20   :  { %v75_v21 = vld [vmem:[#allocation2 + $0x3] sm:$0xff]  ;;  %v66_v23 = vadd.f32 %v62_v20, %v58_v19  ;;  %v77_v29 = vld [vmem:[#allocation2 + $0x1b] sm:$0xff] }
  0x21   :  { %v71_v16 = vadd.f32 %v63_v12, %v23_v0  ;;  %v80_v25 = vadd.f32 %v76_v22, %v72_v17  ;;  %v73_v26 = vadd.f32 %v65_v18, %v25_v2  ;;  %v83_v27 = vld [vmem:[#allocation2 + $0x4] sm:$0xff]  ;;  %v85_v35 = vld [vmem:[#allocation2 + $0x1c] sm:$0xff] }
  0x22   :  { %v74_v30 = vadd.f32 %v66_v23, %v26_v3  ;;  %v78_v34 = vld [vmem:[#allocation2 + $0x23] sm:$0xff] }
  0x23   :  { %v79_v24 = vadd.f32 %v75_v21, %v71_v16  ;;  %v88_v32 = vadd.f32 %v84_v28, %v80_v25  ;;  %v81_v33 = vadd.f32 %v77_v29, %v73_v26  ;;  %v86_v40 = vld [vmem:[#allocation2 + $0x24] sm:$0xff] }
  0x24   :  { %v82_v36 = vadd.f32 %v78_v34, %v74_v30 }
  0x25   :  { %v87_v31 = vadd.f32 %v83_v27, %v79_v24  ;;  %v92_v38 = vmul.f32 0.2, %v88_v32  ;;  %v89_v39 = vadd.f32 %v85_v35, %v81_v33 }
  0x26   :  { %v90_v41 = vadd.f32 %v86_v40, %v82_v36 }
  0x27   :  { %v91_v37 = vmul.f32 0.2, %v87_v31  ;;  %96 = vst [vmem:[#allocation6 + $0x8] sm:$0xff] %v92_v38  ;;  %v93_v42 = vmul.f32 0.2, %v89_v39 }
  0x28   :  { %v94_v43 = vmul.f32 0.2, %v90_v41 }
  0x29   :  { %95 = vst [vmem:[#allocation6] sm:$0xff] %v91_v37  ;;  %97 = vst [vmem:[#allocation6 + $0x10] sm:$0xff] %v93_v42 }
  0x2a   :  { %98 = vst [vmem:[#allocation6 + $0x18] sm:$0xff] %v94_v43 }
  0x2b   :  { %157 = shalt.err (!%p154_p12)
}
  0x2c   :  { %s158_s24 = scalar_lea.hbm %s217_s1, 512 }
  0x2d   :  { %p159_p13 = scmp.ne.s32.totalorder %s217_s1, %s158_s24  ;;  %p162_p0 = scmp.lt.u32.totalorder %s158_s24, %s217_s1 }
  0x2f   :  { %p164_p1 = pnand %p162_p0, %p159_p13 }
  0x31   :  { %167 = shalt.err (!%p164_p1)
}
  0x32   :  { %110 = dma.vmem_to_hbm [thread:$0]  %s105_s20, 512, %s217_s1, [#allocation5], %s173_s16, %s173_s16, %s174_s17  }
  0x33   :  { %170 = dma.done.wait [#allocation5], 512  }
  0x34   :  { %171 = vsyncadd [#allocation5], 4294966784 }
  0x35   :  { %114 = vsyncpa [#allocation4], 1 }
  0x36   :  { %115 = vsyncpa [#allocation5], 1 }

</bundles_post_ra>
